<compile_context>
chip_gen: v5e
topology: v5e:2x2
jax: 0.10.0
libtpu: 0.0.40
codegen_flags: <defaults>
</compile_context>

<pallas_src>
import functools
import math

import jax
import jax.numpy as jnp
from jax.experimental import pallas as pl
from jax.experimental.pallas import tpu as pltpu


_VMEM_LIMIT = 48 * 1024 * 1024      # explicit cap, safe on v5e/v6e/v7x


def _round_up(x, m):
    return (x + m - 1) // m * m


def _pick_tile(dim, cap):
    """Largest multiple of 128 <= cap that evenly divides round_up(dim, 128)."""
    padded = _round_up(dim, 128)
    t = min(cap, padded)
    while padded % t:
        t -= 128
    return t


# ---------------------------------------------------------------------------
# Tiled MXU matmul + bias (+ optional fused residual add).
# bf16 operands / outputs, f32 accumulation.
# Used for: 1x1 convs (incl. fused q/k/v and attention proj), im2col'd
# stride-2 / tiny-Cin convs.
# ---------------------------------------------------------------------------

def _matmul_bias_kernel(a_ref, b_ref, bias_ref, o_ref, acc_ref):
    @pl.when(pl.program_id(2) == 0)
    def _():
        acc_ref[...] = jnp.zeros_like(acc_ref)

    acc_ref[...] += jnp.dot(a_ref[...], b_ref[...],
                            preferred_element_type=jnp.float32)

    @pl.when(pl.program_id(2) == pl.num_programs(2) - 1)
    def _():
        o_ref[...] = (acc_ref[...] + bias_ref[...]).astype(o_ref.dtype)


def _matmul_bias_skip_kernel(a_ref, b_ref, bias_ref, skip_ref, o_ref, acc_ref):
    @pl.when(pl.program_id(2) == 0)
    def _():
        acc_ref[...] = jnp.zeros_like(acc_ref)

    acc_ref[...] += jnp.dot(a_ref[...], b_ref[...],
                            preferred_element_type=jnp.float32)

    @pl.when(pl.program_id(2) == pl.num_programs(2) - 1)
    def _():
        o_ref[...] = (acc_ref[...] + bias_ref[...]
                      + skip_ref[...].astype(jnp.float32)).astype(o_ref.dtype)


@jax.jit
def pallas_matmul_bias(a, b, bias, skip=None):
    """(M,K) @ (K,N) + bias[N] (+ skip[M,N]); bf16 operands, f32 accumulation."""
    M, K = a.shape
    _, N = b.shape
    a = a.astype(jnp.bfloat16)
    b = b.astype(jnp.bfloat16)
    bias = bias.astype(jnp.float32).reshape(1, N)

    tm = min(_round_up(M, 16), 512)
    tk = _pick_tile(K, 512)
    tn = _pick_tile(N, 512)
    Mp, Kp, Np = _round_up(M, tm), _round_up(K, tk), _round_up(N, tn)

    a_p = a if (Mp == M and Kp == K) else jnp.pad(a, ((0, Mp - M), (0, Kp - K)))
    b_p = b if (Kp == K and Np == N) else jnp.pad(b, ((0, Kp - K), (0, Np - N)))
    bias_p = bias if Np == N else jnp.pad(bias, ((0, 0), (0, Np - N)))

    in_specs = [
        pl.BlockSpec((tm, tk), lambda i, j, k: (i, k)),
        pl.BlockSpec((tk, tn), lambda i, j, k: (k, j)),
        pl.BlockSpec((1, tn), lambda i, j, k: (0, j)),
    ]
    operands = [a_p, b_p, bias_p]
    kernel = _matmul_bias_kernel
    if skip is not None:
        skip = skip.astype(jnp.bfloat16)
        skip_p = skip if (Mp == M and Np == N) else jnp.pad(
            skip, ((0, Mp - M), (0, Np - N)))
        in_specs.append(pl.BlockSpec((tm, tn), lambda i, j, k: (i, j)))
        operands.append(skip_p)
        kernel = _matmul_bias_skip_kernel

    out = pl.pallas_call(
        kernel,
        out_shape=jax.ShapeDtypeStruct((Mp, Np), jnp.bfloat16),
        grid_spec=pltpu.PrefetchScalarGridSpec(
            num_scalar_prefetch=0,
            grid=(Mp // tm, Np // tn, Kp // tk),
            in_specs=in_specs,
            out_specs=pl.BlockSpec((tm, tn), lambda i, j, k: (i, j)),
            scratch_shapes=[pltpu.VMEM((tm, tn), jnp.float32)],
        ),
        compiler_params=pltpu.CompilerParams(
            dimension_semantics=("parallel", "parallel", "arbitrary"),
            vmem_limit_bytes=_VMEM_LIMIT),
    )(*operands)
    if Mp != M or Np != N:
        out = out[:M, :N]
    return out


# ---------------------------------------------------------------------------
# Direct 3x3 / stride-1 / pad-1 convolution, row-tiled with a manual
# double-buffered halo DMA (no full im2col, no per-sample VMEM blow-up).
#
# The wrapper builds a width-only im2col layout xw[b, i, x, dx*Cin+c] =
# pad(x)[b, i, x+dx, c] flattened to (B, (H+2)*W, 3*Cin).  Output pixel
# (y, x) only needs flat rows (y+dy)*W + x for dy in {0,1,2}, so a tile of th
# output rows reads a contiguous (th+2)*W-row halo window and does 3 aligned
# shifted-view matmuls with K = 3*Cin.
# ---------------------------------------------------------------------------

def _make_conv3x3_kernel(th, W, nR, with_skip):
    lo = th * W              # flat rows produced per tile
    lt = (th + 2) * W        # flat rows read per tile (incl. halo)

    def kernel(x_hbm, w_ref, b_ref, *rest):
        if with_skip:
            skip_ref, o_ref, xbuf, sem = rest
        else:
            o_ref, xbuf, sem = rest
            skip_ref = None

        b = pl.program_id(0)
        r = pl.program_id(1)

        def start_fetch(tile, slot):
            pltpu.make_async_copy(
                x_hbm.at[b, pl.ds(tile * lo, lt), :],
                xbuf.at[slot], sem.at[slot]).start()

        # Prime the double buffer at the start of every sample's row loop.
        @pl.when(r == 0)
        def _():
            start_fetch(0, 0)
            if nR > 1:
                start_fetch(1, 1)

        slot = r % 2
        pltpu.make_async_copy(
            x_hbm.at[b, pl.ds(0, lt), :], xbuf.at[slot], sem.at[slot]).wait()

        # Prefetch the next halo window while computing this one.
        if nR > 2:
            @pl.when(jnp.logical_and(r >= 1, r + 1 < nR))
            def _():
                start_fetch(r + 1, (r + 1) % 2)

        xv = xbuf[slot]                                     # (lt, 3*Cin) bf16
        acc = jnp.dot(xv[0:lo], w_ref[0],
                      preferred_element_type=jnp.float32)
        acc += jnp.dot(xv[W:W + lo], w_ref[1],
                       preferred_element_type=jnp.float32)
        acc += jnp.dot(xv[2 * W:2 * W + lo], w_ref[2],
                       preferred_element_type=jnp.float32)
        acc += b_ref[...]
        if with_skip:
            acc += skip_ref[0].astype(jnp.float32)          # fused residual add
        o_ref[0] = acc.astype(o_ref.dtype)

    return kernel


@jax.jit
def conv3x3_s1(x, w, b, skip=None):
    """3x3, stride 1, pad 1 conv, NHWC, direct (optional fused residual add)."""
    B, H, W, Cin = x.shape
    Cout = w.shape[-1]
    K3 = 3 * Cin

    x = x.astype(jnp.bfloat16)
    xpad = jnp.pad(x, ((0, 0), (1, 1), (1, 1), (0, 0)))
    # Width-only im2col: (B, H+2, W, 3*Cin), channel order (dx, cin).
    xw = jnp.concatenate(
        [xpad[:, :, 0:W, :], xpad[:, :, 1:W + 1, :], xpad[:, :, 2:W + 2, :]],
        axis=-1)
    xwf = xw.reshape(B, (H + 2) * W, K3)
    w3 = w.reshape(3, K3, Cout).astype(jnp.bfloat16)
    b2 = b.reshape(1, Cout).astype(jnp.float32)

    # Row-tile height: largest divisor of H whose bf16 halo window is <= ~2 MiB.
    th = H
    while th > 1 and (th + 2) * W * K3 * 2 > (2 << 20):
        th = th // 2 if th % 2 == 0 else 1
    nR = H // th
    lo = th * W
    lt = (th + 2) * W

    in_specs = [
        pl.BlockSpec(memory_space=pl.ANY),                        # x (HBM)
        pl.BlockSpec((3, K3, Cout), lambda bb, r: (0, 0, 0)),      # weights
        pl.BlockSpec((1, Cout), lambda bb, r: (0, 0)),             # bias
    ]
    operands = [xwf, w3, b2]
    if skip is not None:
        in_specs.append(pl.BlockSpec((1, lo, Cout), lambda bb, r: (bb, r, 0)))
        operands.append(skip.reshape(B, H * W, Cout).astype(jnp.bfloat16))

    kernel = _make_conv3x3_kernel(th, W, nR, with_skip=skip is not None)
    out = pl.pallas_call(
        kernel,
        out_shape=jax.ShapeDtypeStruct((B, H * W, Cout), jnp.bfloat16),
        grid_spec=pltpu.PrefetchScalarGridSpec(
            num_scalar_prefetch=0,
            grid=(B, nR),
            in_specs=in_specs,
            out_specs=pl.BlockSpec((1, lo, Cout), lambda bb, r: (bb, r, 0)),
            scratch_shapes=[
                pltpu.VMEM((2, lt, K3), jnp.bfloat16),
                pltpu.SemaphoreType.DMA((2,)),
            ],
        ),
        compiler_params=pltpu.CompilerParams(
            dimension_semantics=("parallel", "arbitrary"),
            vmem_limit_bytes=_VMEM_LIMIT),
    )(*operands)
    return out.reshape(B, H, W, Cout)


# ---------------------------------------------------------------------------
# Generic conv dispatcher
# ---------------------------------------------------------------------------

@functools.partial(jax.jit, static_argnames=("stride", "padding"))
def conv2d(x, w, b, stride=1, padding=0):
    """NHWC convolution; w is (kh, kw, cin, cout)."""
    B, H, W, _ = x.shape
    KH, KW, Cin, Cout = w.shape
    if KH == 1 and KW == 1 and stride == 1 and padding == 0:
        y = pallas_matmul_bias(x.reshape(B * H * W, Cin), w.reshape(Cin, Cout), b)
        return y.reshape(B, H, W, Cout)
    if KH == 3 and KW == 3 and stride == 1 and padding == 1 and Cin >= 32:
        return conv3x3_s1(x, w, b)
    # Fallback: bf16 im2col + matmul (first conv Cin=3, stride-2 downsamples).
    x = x.astype(jnp.bfloat16)
    if padding > 0:
        x = jnp.pad(x, ((0, 0), (padding, padding), (padding, padding), (0, 0)))
    Hp, Wpd = x.shape[1], x.shape[2]
    Ho = (Hp - KH) // stride + 1
    Wo = (Wpd - KW) // stride + 1
    patches = []
    for dy in range(KH):
        for dx in range(KW):
            patches.append(
                x[:, dy:dy + stride * Ho:stride, dx:dx + stride * Wo:stride, :])
    a = jnp.concatenate(patches, axis=-1).reshape(B * Ho * Wo, KH * KW * Cin)
    y = pallas_matmul_bias(a, w.reshape(KH * KW * Cin, Cout), b)
    return y.reshape(B, Ho, Wo, Cout)


# ---------------------------------------------------------------------------
# Two-pass, HW-tiled GroupNorm(32, eps=1e-6) [+ fused Swish]
# ---------------------------------------------------------------------------

def _gn_stats_kernel(x_ref, o_ref):
    t = pl.program_id(1)
    x = x_ref[0].astype(jnp.float32)                       # (t, C)
    s = jnp.sum(x, axis=0, keepdims=True)                  # (1, C)
    ss = jnp.sum(x * x, axis=0, keepdims=True)             # (1, C)
    stats = jnp.concatenate([s, ss], axis=0)               # (2, C)

    @pl.when(t == 0)
    def _():
        o_ref[0] = stats

    @pl.when(t > 0)
    def _():
        o_ref[0] += stats


def _gn_apply_kernel(x_ref, a_ref, b_ref, o_ref, *, swish):
    x = x_ref[0].astype(jnp.float32)                       # (t, C)
    y = x * a_ref[0] + b_ref[0]
    if swish:
        y = y * (1.0 / (1.0 + jnp.exp(-y)))                # Swish: x * sigmoid(x)
    o_ref[0] = y.astype(o_ref.dtype)


@functools.partial(jax.jit, static_argnames=("swish",))
def pallas_groupnorm(x, gamma, beta, swish):
    """x: (B, HW, C); GroupNorm with 32 groups, eps=1e-6, optional fused swish."""
    B, HW, C = x.shape
    G = 32
    Cg = C // G
    x = x.astype(jnp.bfloat16)

    # HW tile: largest power-of-two divisor whose bf16 block is <= ~2 MiB.
    t = HW
    while t > 1 and t * C * 2 > (2 << 20):
        t = t // 2 if t % 2 == 0 else 1
    if HW % t:
        t = HW
    nT = HW // t

    stats = pl.pallas_call(
        _gn_stats_kernel,
        out_shape=jax.ShapeDtypeStruct((B, 2, C), jnp.float32),
        grid=(B, nT),
        in_specs=[pl.BlockSpec((1, t, C), lambda b, i: (b, i, 0))],
        out_specs=pl.BlockSpec((1, 2, C), lambda b, i: (b, 0, 0)),
        compiler_params=pltpu.CompilerParams(
            dimension_semantics=("parallel", "arbitrary"),
            vmem_limit_bytes=_VMEM_LIMIT),
    )(x)

    # Tiny (B, C) -> (B, G) -> (B, C) group statistics in plain JAX (f32).
    inv_n = 1.0 / (HW * Cg)
    s = stats[:, 0, :]
    ss = stats[:, 1, :]
    mean_g = s.reshape(B, G, Cg).sum(-1) * inv_n
    msq_g = ss.reshape(B, G, Cg).sum(-1) * inv_n
    var_g = msq_g - mean_g * mean_g
    rstd_g = jax.lax.rsqrt(var_g + 1e-6)
    mean_c = jnp.repeat(mean_g, Cg, axis=1)                # (B, C)
    rstd_c = jnp.repeat(rstd_g, Cg, axis=1)
    a = (rstd_c * gamma[None, :]).reshape(B, 1, C)
    bshift = (beta[None, :] - mean_c * rstd_c * gamma[None, :]).reshape(B, 1, C)

    return pl.pallas_call(
        functools.partial(_gn_apply_kernel, swish=swish),
        out_shape=jax.ShapeDtypeStruct((B, HW, C), jnp.bfloat16),
        grid=(B, nT),
        in_specs=[
            pl.BlockSpec((1, t, C), lambda b, i: (b, i, 0)),
            pl.BlockSpec((1, 1, C), lambda b, i: (b, 0, 0)),
            pl.BlockSpec((1, 1, C), lambda b, i: (b, 0, 0)),
        ],
        out_specs=pl.BlockSpec((1, t, C), lambda b, i: (b, i, 0)),
        compiler_params=pltpu.CompilerParams(
            dimension_semantics=("parallel", "parallel"),
            vmem_limit_bytes=_VMEM_LIMIT),
    )(x, a, bshift)


# ---------------------------------------------------------------------------
# Fused NonLocal (self-attention) kernel, one batch element per grid step.
# HW <= 256 for this architecture (attention lives at resolution 16).
# ---------------------------------------------------------------------------

def _attention_kernel(q_ref, k_ref, v_ref, o_ref):
    scale = q_ref.shape[-1] ** (-0.5)                      # c ** (-0.5)
    q = q_ref[0] * scale                                   # fold scale into q (bf16)
    k = k_ref[0]
    s = jax.lax.dot_general(q, k, (((1,), (1,)), ((), ())),
                            preferred_element_type=jnp.float32)
    s = s - jnp.max(s, axis=-1, keepdims=True)
    p = jnp.exp(s)
    denom = jnp.sum(p, axis=-1, keepdims=True)
    p = p * pl.reciprocal(denom, approx=True)              # softmax over keys
    o_ref[0] = jnp.dot(p.astype(jnp.bfloat16), v_ref[0],
                       preferred_element_type=jnp.float32).astype(o_ref.dtype)


@jax.jit
def pallas_attention(q, k, v):
    B, HW, C = q.shape
    q = q.astype(jnp.bfloat16)
    k = k.astype(jnp.bfloat16)
    v = v.astype(jnp.bfloat16)
    spec = pl.BlockSpec((1, HW, C), lambda i: (i, 0, 0))
    return pl.pallas_call(
        _attention_kernel,
        out_shape=jax.ShapeDtypeStruct((B, HW, C), jnp.bfloat16),
        grid=(B,),
        in_specs=[spec, spec, spec],
        out_specs=spec,
        compiler_params=pltpu.CompilerParams(
            dimension_semantics=("parallel",),
            vmem_limit_bytes=_VMEM_LIMIT),
    )(q, k, v)


# ---------------------------------------------------------------------------
# Parameter construction (deterministic, mirrors the PyTorch __init__ shapes)
# ---------------------------------------------------------------------------

class _KeyGen:
    def __init__(self, key):
        self._key = key

    def __call__(self):
        self._key, sub = jax.random.split(self._key)
        return sub


def make_conv_p(kg, cin, cout, ksize):
    fan_in = cin * ksize * ksize
    s = 1.0 / math.sqrt(fan_in)
    return {"w": jax.random.uniform(kg(), (ksize, ksize, cin, cout), jnp.float32, -s, s),
            "b": jax.random.uniform(kg(), (cout,), jnp.float32, -s, s)}


def make_gn_p(c):
    return {"gamma": jnp.ones((c,), jnp.float32), "beta": jnp.zeros((c,), jnp.float32)}


def make_res_p(kg, cin, cout):
    p = {"gn1": make_gn_p(cin), "conv1": make_conv_p(kg, cin, cout, 3),
         "gn2": make_gn_p(cout), "conv2": make_conv_p(kg, cout, cout, 3)}
    if cin != cout:
        p["channel_up"] = make_conv_p(kg, cin, cout, 1)
    return p


def make_attn_p(kg, c):
    q = make_conv_p(kg, c, c, 1)
    k = make_conv_p(kg, c, c, 1)
    v = make_conv_p(kg, c, c, 1)
    p = {"gn": make_gn_p(c), "q": q, "k": k, "v": v,
         "proj": make_conv_p(kg, c, c, 1)}
    # Precompute the fused q/k/v weight / bias (review item: no per-call concat).
    p["wqkv"] = jnp.concatenate(
        [q["w"].reshape(c, c), k["w"].reshape(c, c), v["w"].reshape(c, c)], axis=1)
    p["bqkv"] = jnp.concatenate([q["b"], k["b"], v["b"]])
    return p


def build_encoder(kg, latent_dim, image_channels):
    channels = [128, 128, 128, 256, 256, 512]
    attn_resolutions = [16]
    num_res_blocks = 2
    resolution = 256
    layers = [{"kind": "conv", "p": make_conv_p(kg, image_channels, channels[0], 3),
               "stride": 1, "pad": 1}]
    for i in range(len(channels) - 1):
        in_c, out_c = channels[i], channels[i + 1]
        for _ in range(num_res_blocks):
            layers.append({"kind": "res", "p": make_res_p(kg, in_c, out_c)})
            in_c = out_c
            if resolution in attn_resolutions:
                layers.append({"kind": "attn", "p": make_attn_p(kg, in_c)})
        if i != len(channels) - 2:
            layers.append({"kind": "down",
                           "p": make_conv_p(kg, channels[i + 1], channels[i + 1], 3)})
            resolution //= 2
    layers.append({"kind": "res", "p": make_res_p(kg, channels[-1], channels[-1])})
    layers.append({"kind": "attn", "p": make_attn_p(kg, channels[-1])})
    layers.append({"kind": "res", "p": make_res_p(kg, channels[-1], channels[-1])})
    layers.append({"kind": "gnswish", "p": make_gn_p(channels[-1])})
    layers.append({"kind": "conv", "p": make_conv_p(kg, channels[-1], latent_dim, 3),
                   "stride": 1, "pad": 1})
    return layers


def init_encoder_params(key, latent_dim, image_channels):
    kg = _KeyGen(key)
    return {"encoder": build_encoder(kg, latent_dim, image_channels)}


# ---------------------------------------------------------------------------
# Module application
# ---------------------------------------------------------------------------

def apply_gn(p, x, swish):
    B, H, W, C = x.shape
    y = pallas_groupnorm(x.reshape(B, H * W, C), p["gamma"], p["beta"], swish=swish)
    return y.reshape(B, H, W, C)


def apply_residual_block(p, x):
    h = apply_gn(p["gn1"], x, swish=True)
    h = conv2d(h, p["conv1"]["w"], p["conv1"]["b"], stride=1, padding=1)
    h = apply_gn(p["gn2"], h, swish=True)
    if "channel_up" in p:
        skip = conv2d(x, p["channel_up"]["w"], p["channel_up"]["b"],
                      stride=1, padding=0)
    else:
        skip = x
    # Second 3x3 conv with the residual add fused into its epilogue.
    return conv3x3_s1(h, p["conv2"]["w"], p["conv2"]["b"], skip=skip)


def apply_nonlocal_block(p, x):
    B, H, W, C = x.shape
    h = apply_gn(p["gn"], x, swish=False)
    # Fused q/k/v 1x1 convolutions: one matmul with N = 3C (reads h once).
    qkv = pallas_matmul_bias(h.reshape(B * H * W, C), p["wqkv"], p["bqkv"])
    qkv = qkv.reshape(B, H * W, 3 * C)
    q, k, v = qkv[..., :C], qkv[..., C:2 * C], qkv[..., 2 * C:]
    a = pallas_attention(q, k, v)
    # Projection 1x1 conv with the residual add fused into its epilogue.
    out = pallas_matmul_bias(a.reshape(B * H * W, C),
                             p["proj"]["w"].reshape(C, C), p["proj"]["b"],
                             skip=x.reshape(B * H * W, C))
    return out.reshape(B, H, W, C)


def apply_downsample(p, x):
    x = jnp.pad(x, ((0, 0), (0, 1), (0, 1), (0, 0)))      # F.pad(x, (0,1,0,1))
    return conv2d(x, p["w"], p["b"], stride=2, padding=0)


def apply_sequential(layers, x):
    for layer in layers:
        kind, p = layer["kind"], layer["p"]
        if kind == "conv":
            x = conv2d(x, p["w"], p["b"], stride=layer["stride"], padding=layer["pad"])
        elif kind == "res":
            x = apply_residual_block(p, x)
        elif kind == "attn":
            x = apply_nonlocal_block(p, x)
        elif kind == "down":
            x = apply_downsample(p, x)
        elif kind == "gnswish":
            x = apply_gn(p, x, swish=True)
        else:
            raise ValueError(kind)
    return x


def encoder_forward(params, imgs_nchw):
    """Matches Encoder.forward: NCHW image -> NCHW latent (latent_dim channels)."""
    x = jnp.transpose(imgs_nchw, (0, 2, 3, 1)).astype(jnp.bfloat16)   # -> NHWC bf16
    x = apply_sequential(params["encoder"], x)
    return jnp.transpose(x, (0, 3, 1, 2)).astype(jnp.float32)         # -> NCHW f32


if __name__ == "__main__":
    latent_dim = 32
    image_channels = 3

    root = jax.random.PRNGKey(0)
    pkey, xkey = jax.random.split(root)
    params = init_encoder_params(pkey, latent_dim, image_channels)

    # 32x32 images: the fixed encoder downsamples 4x -> a 2x2 latent grid.
    imgs = jax.random.normal(xkey, (2, image_channels, 32, 32), jnp.float32)

    z = encoder_forward(params, imgs)
    jax.block_until_ready(z)

    assert z.shape == (2, latent_dim, 2, 2)
    assert bool(jnp.all(jnp.isfinite(z)))
    print("KERNEL_OK")
</pallas_src>

<mosaic_0001>
module attributes {stable_mosaic.version = 11 : i64} {
  func.func @_matmul_bias_kernel(%arg0: i32, %arg1: i32, %arg2: i32, %arg3: memref<512x128xbf16, #tpu.memory_space<vmem>>, %arg4: memref<128x128xbf16, #tpu.memory_space<vmem>>, %arg5: memref<1x128xf32, #tpu.memory_space<vmem>>, %arg6: memref<512x128xbf16, #tpu.memory_space<vmem>>, %arg7: memref<512x128xf32, #tpu.memory_space<vmem>>) attributes {dimension_semantics = [#tpu.dimension_semantics<parallel>, #tpu.dimension_semantics<parallel>, #tpu.dimension_semantics<arbitrary>], iteration_bounds = array<i64: 4, 1, 1>, scalar_prefetch = 0 : i64, scratch_operands = 1 : i64, tpu.core_type = #tpu.core_type<tc>, window_params = [{transform_indices = @transform_0, window_bounds = array<i64: 512, 128>}, {transform_indices = @transform_1, window_bounds = array<i64: 128, 128>}, {transform_indices = @transform_2, window_bounds = array<i64: 1, 128>}, {transform_indices = @transform_3, window_bounds = array<i64: 512, 128>}]} {
    %c0_i32 = arith.constant 0 : i32
    %0 = arith.cmpi eq, %arg2, %c0_i32 : i32
    %1 = arith.extui %0 : i1 to i32
    %c0_i32_0 = arith.constant 0 : i32
    %2 = arith.cmpi ne, %1, %c0_i32_0 : i32
    scf.if %2 {
      %cst_10 = arith.constant 0.000000e+00 : f32
      %12 = vector.broadcast %cst_10 : f32 to vector<512x128xf32>
      %c0_11 = arith.constant 0 : index
      %c0_12 = arith.constant 0 : index
      %13 = vector.load %arg7[%c0_11, %c0_12] : memref<512x128xf32, #tpu.memory_space<vmem>>, vector<512x128xf32>
      tpu.vector_store %arg7[%c0_11, %c0_12], %12 {strides = array<i32>} : memref<512x128xf32, #tpu.memory_space<vmem>>, vector<512x128xf32>,
    } else {
    }
    %c0 = arith.constant 0 : index
    %c0_1 = arith.constant 0 : index
    %3 = vector.load %arg7[%c0, %c0_1] : memref<512x128xf32, #tpu.memory_space<vmem>>, vector<512x128xf32>
    %c0_2 = arith.constant 0 : index
    %c0_3 = arith.constant 0 : index
    %4 = vector.load %arg3[%c0_2, %c0_3] : memref<512x128xbf16, #tpu.memory_space<vmem>>, vector<512x128xbf16>
    %c0_4 = arith.constant 0 : index
    %c0_5 = arith.constant 0 : index
    %5 = vector.load %arg4[%c0_4, %c0_5] : memref<128x128xbf16, #tpu.memory_space<vmem>>, vector<128x128xbf16>
    %cst = arith.constant dense<0.000000e+00> : vector<512x128xf32>
    %6 = tpu.matmul %4, %5, %cst {dimension_numbers = #tpu.dot_dimension_numbers<[1], [0], [0], [1], [0, 0, 1, 1], [], []>} : vector<512x128xbf16>, vector<128x128xbf16>, vector<512x128xf32> -> vector<512x128xf32>
    %7 = arith.addf %3, %6 : vector<512x128xf32>
    %c0_6 = arith.constant 0 : index
    %c0_7 = arith.constant 0 : index
    %8 = vector.load %arg7[%c0_6, %c0_7] : memref<512x128xf32, #tpu.memory_space<vmem>>, vector<512x128xf32>
    tpu.vector_store %arg7[%c0_6, %c0_7], %7 {strides = array<i32>} : memref<512x128xf32, #tpu.memory_space<vmem>>, vector<512x128xf32>,
    %c0_i32_8 = arith.constant 0 : i32
    %9 = arith.cmpi eq, %arg2, %c0_i32_8 : i32
    %10 = arith.extui %9 : i1 to i32
    %c0_i32_9 = arith.constant 0 : i32
    %11 = arith.cmpi ne, %10, %c0_i32_9 : i32
    scf.if %11 {
      %c0_10 = arith.constant 0 : index
      %c0_11 = arith.constant 0 : index
      %12 = vector.load %arg7[%c0_10, %c0_11] : memref<512x128xf32, #tpu.memory_space<vmem>>, vector<512x128xf32>
      %c0_12 = arith.constant 0 : index
      %c0_13 = arith.constant 0 : index
      %13 = vector.load %arg5[%c0_12, %c0_13] : memref<1x128xf32, #tpu.memory_space<vmem>>, vector<1x128xf32>
      %14 = vector.broadcast %13 : vector<1x128xf32> to vector<512x128xf32>
      %15 = arith.addf %12, %14 : vector<512x128xf32>
      %16 = arith.truncf %15 : vector<512x128xf32> to vector<512x128xbf16>
      %c0_14 = arith.constant 0 : index
      %c0_15 = arith.constant 0 : index
      %17 = vector.load %arg6[%c0_14, %c0_15] : memref<512x128xbf16, #tpu.memory_space<vmem>>, vector<512x128xbf16>
      tpu.vector_store %arg6[%c0_14, %c0_15], %16 {strides = array<i32>} : memref<512x128xbf16, #tpu.memory_space<vmem>>, vector<512x128xbf16>,
    } else {
    }
    return
  }
  func.func @transform_0(%arg0: i32, %arg1: i32, %arg2: i32) -> (i32, i32) {
    %c0_i32 = arith.constant 0 : i32
    return %arg0, %arg2 : i32, i32
  }
  func.func @transform_1(%arg0: i32, %arg1: i32, %arg2: i32) -> (i32, i32) {
    %c0_i32 = arith.constant 0 : i32
    return %arg2, %arg1 : i32, i32
  }
  func.func @transform_2(%arg0: i32, %arg1: i32, %arg2: i32) -> (i32, i32) {
    %c0_i32 = arith.constant 0 : i32
    %c0_i32_0 = arith.constant 0 : i32
    return %c0_i32, %arg1 : i32, i32
  }
  func.func @transform_3(%arg0: i32, %arg1: i32, %arg2: i32) -> (i32, i32) {
    %c0_i32 = arith.constant 0 : i32
    return %arg0, %arg1 : i32, i32
  }
}

</mosaic_0001>

<bundles_post_ra>
// kernel: pallas_matmul_bias.1
= control target key start
LH: loop header
LB: loop body
LE: loop exit
PB: predicated region body
PF: predicated region fallthrough
CT: control target
= control target key end

     0   :  { %8 = vsyncpa [#allocation4], 0  ;;  %s2241_s0 = inlined_call_operand.vmem [shape: bf16[2048,128], index: 0, kind: input, shape index: {}]   ;;  %s2242_s1 = inlined_call_operand.vmem [shape: bf16[128,128], index: 1, kind: input, shape index: {}]   ;;  %s2243_s2 = inlined_call_operand.vmem [shape: f32[1,128], index: 2, kind: input, shape index: {}]   ;;  %s2244_s3 = inlined_call_operand.hbm [shape: bf16[2048,128], index: 3, kind: output, shape index: {}]  }
   0x1   :  { %10 = vsyncpa [#allocation4 + $0x1], 0  ;;  %s1979_s12 = smov 0   ;;  %s1981_s13 = smov 0  }
   0x2   :  { %s1983_s14 = smov 0   ;;  %s1985_s15 = smov 0  }
   0x3   :  { %s1987_s16 = smov 0   ;;  %s1989_s17 = smov 0  }
   0x4 LB: > { %s1388_s18 = sadd.s32 4294967295, %s1955_s17   ;;  %s1389_s19 = sadd.s32 4294967294, %s1955_s17   ;;  %s1955_s17 = sphi %s1989_s17, %s16_s17   ;;  %s1951_s16 = sphi %s1987_s16, %s2251_s16   ;;  %s1947_s15 = sphi %s1985_s15, %s2250_s15   ;;  %s1943_s14 = sphi %s1983_s14, %s2249_s14   ;;  %s1939_s13 = sphi %s1981_s13, %s2248_s13   ;;  %s1935_s12 = sphi %s1979_s12, %s2247_s12  }
   0x5   : > { %s35_s20 = sadd.s32 1, %s1951_s16  ;;  %s126_s21 = sadd.s32 1, %s1943_s14 }
   0x6   : > { %p37_p0 = scmp.ge.s32.totalorder %s35_s20, 4  ;;  %p136_p1 = scmp.ne.s32.totalorder %s1943_s14, %s1939_s13 }
   0x7   : > { %p137_p2 = scmp.eq.s32.totalorder %s1388_s18, 3  ;;  %p142_p3 = scmp.ne.s32.totalorder %s1939_s13, %s1935_s12 }
   0x8   : > { %s2253_s20 = smov (%p37_p0, %s35_s20), 0  ;;  %p143_p5 = scmp.eq.s32.totalorder %s1389_s19, 3 }
   0x9   : > { %p2019_p4 = por %p137_p2, %p136_p1  ;;  %s121_s23 = ssub.s32 %s1951_s16, %s2253_s20 }
   0xa   : > { %p1394_p6 = scmp.ge.s32.totalorder %s1955_s17, 1  ;;  %p124_p7 = scmp.eq.s32.totalorder %s121_s23, 0 }
   0xb   : > { %p2026_p8 = por %p143_p5, %p142_p3  ;;  %p191_p9 = scmp.lt.s32.totalorder %s1955_s17, 5 }
   0xc   : > { %s2032_s25 = scalar_select %p124_p7, %s1943_s14, %s126_s21  }
   0xd   : > { %p192_p10 = pnand %p1394_p6, %p191_p9 }
   0xe   : > { %s1396_s7 = sshll.u32 (!%p192_p10), %s1947_s15, 6  ;;  %s226_s30 = sand.u32 (!%p192_p10), 1, %s1939_s13  }
   0xf   : > { %195 = sbr.rel (%p192_p10) target bundleno = 314 (0x13a), region = 32  ;;  %p230_p11 = scmp.lt.s32.totalorder (!%p192_p10), %s1396_s7, 255 }
  0x10   : > { %s1395_s6 = sshll.u32 (!%p192_p10), %s226_s30, 8  ;;  %s1603_s8 = sshll.u32 (!%p192_p10), %s1947_s15, 8 }
  0x11   : > { %s1276_s11 = scalar_lea.hbm (!%p192_p10), %s2244_s3, %s1603_s8  ;;  %s1264_s15 = scalar_lea.sflag (!%p192_p10), [#allocation4], %s226_s30 }
  0x12   : > { %s1279_s19 = sshll.u32 (!%p192_p10), %s1276_s11, 4  ;;  %s1897_s28 = scalar_lea.hbm (!%p192_p10), %s2244_s3, 1024  ;;  %s1280_s19 = int_to_ptr.hbm [resolvable:$true] %s1279_s19 }
  0x14   : > { %v1602_v0 = vld [vmem:[%s2242_s1 + $0x38] sm:$0xff]  ;;  %v1601_v1 = vld [vmem:[%s2242_s1 + $0x30] sm:$0xff]  ;;  %v1600_v2 = vld [vmem:[%s2242_s1 + $0x28] sm:$0xff]  ;;  %s2255_s7 = smov (!%p230_p11, %s1396_s7), 255 }
  0x15   : > { %703 = vmatpush.bf16.msra.mxu0 %v1602_v0  ;;  %1795 = vmatpush.bf16.msra.mxu1 %v1602_v0  ;;  %v1599_v3 = vld [vmem:[%s2242_s1 + $0x20] sm:$0xff]  ;;  %v1598_v4 = vld [vmem:[%s2242_s1 + $0x18] sm:$0xff]  ;;  %v1597_v5 = vld [vmem:[%s2242_s1 + $0x10] sm:$0xff]  ;;  %s1397_s21 = sshll.u32 %s2255_s7, 2  ;;  %s2108_s7 = scalar_lea.vmem [#allocation3], %s1395_s6 }
  0x16   : > { %1796 = vmatpush.bf16.msra.mxu2 %v1602_v0  ;;  %1797 = vmatpush.bf16.msra.mxu3 %v1602_v0  ;;  %v1596_v6 = vld [vmem:[%s2242_s1 + $0x8] sm:$0xff]  ;;  %v1595_v7 = vld [vmem:[%s2242_s1] sm:$0xff]  ;;  %s2062_s29 = scalar_lea.vmem %s2241_s0, %s1397_s21  ;;  %s1277_s18 = sshll.u32 %s2108_s7, 4  ;;  %s1278_s18 = int_to_ptr.vmem [resolvable:$true] %s1277_s18 }
  0x17   : > { %v1563_v8 = vld [vmem:[%s2062_s29] sm:$0xff]  ;;  %v1564_v12 = vld [vmem:[%s2062_s29 + $0x8] sm:$0xff]  ;;  %v1565_v16 = vld [vmem:[%s2062_s29 + $0x10] sm:$0xff]  ;;  %s1891_s21 = sshra.s32 %s1280_s19, 4  ;;  %s1892_s21 = int_to_ptr.hbm [resolvable:$true] %s1891_s21 }
  0x18   : > { %v1571_v9 = vld [vmem:[%s2062_s29 + $0x40] sm:$0xff]  ;;  %v1572_v13 = vld [vmem:[%s2062_s29 + $0x48] sm:$0xff]  ;;  %v1573_v17 = vld [vmem:[%s2062_s29 + $0x50] sm:$0xff]  ;;  %s1893_s23 = scalar_lea.hbm %s1892_s21, 256  ;;  %p1898_p1 = scmp.lt.s32.totalorder %s1892_s21, %s2244_s3 }
  0x19   : > { %704 = vmatpush.bf16.msra.mxu0 %v1601_v1  ;;  %1798 = vmatpush.bf16.msra.mxu1 %v1601_v1  ;;  %v1579_v10 = vld [vmem:[%s2062_s29 + $0x80] sm:$0xff]  ;;  %v1580_v14 = vld [vmem:[%s2062_s29 + $0x88] sm:$0xff]  ;;  %v1581_v18 = vld [vmem:[%s2062_s29 + $0x90] sm:$0xff]  ;;  %p1894_p12 = scmp.ne.s32.totalorder %s1892_s21, %s1893_s23  ;;  %p1899_p2 = scmp.lt.s32.totalorder %s1897_s28, %s1893_s23 }
  0x1a   : > { %1799 = vmatpush.bf16.msra.mxu2 %v1601_v1  ;;  %1800 = vmatpush.bf16.msra.mxu3 %v1601_v1  ;;  %v1587_v11 = vld [vmem:[%s2062_s29 + $0xc0] sm:$0xff]  ;;  %v1588_v15 = vld [vmem:[%s2062_s29 + $0xc8] sm:$0xff]  ;;  %v1589_v19 = vld [vmem:[%s2062_s29 + $0xd0] sm:$0xff] }
  0x1b   : > { %v1566_v20 = vld [vmem:[%s2062_s29 + $0x18] sm:$0xff]  ;;  %v1567_v24 = vld [vmem:[%s2062_s29 + $0x20] sm:$0xff]  ;;  %v1568_v28 = vld [vmem:[%s2062_s29 + $0x28] sm:$0xff]  ;;  %p1895_p13 = pnand %p1894_p12, %p2019_p4  ;;  %p1900_p3 = por %p1899_p2, %p1898_p1 }
  0x1c   : > { %v1574_v21 = vld [vmem:[%s2062_s29 + $0x58] sm:$0xff]  ;;  %v1575_v25 = vld [vmem:[%s2062_s29 + $0x60] sm:$0xff]  ;;  %v1576_v29 = vld [vmem:[%s2062_s29 + $0x68] sm:$0xff] }
  0x1d   : > { %705 = vmatpush.bf16.msra.mxu0 %v1600_v2  ;;  %1801 = vmatpush.bf16.msra.mxu1 %v1600_v2  ;;  %v1582_v22 = vld [vmem:[%s2062_s29 + $0x98] sm:$0xff]  ;;  %v1583_v26 = vld [vmem:[%s2062_s29 + $0xa0] sm:$0xff]  ;;  %v1584_v30 = vld [vmem:[%s2062_s29 + $0xa8] sm:$0xff]  ;;  %p1896_p0 = pneg %p1895_p13 }
  0x1e   : > { %1802 = vmatpush.bf16.msra.mxu2 %v1600_v2  ;;  %1803 = vmatpush.bf16.msra.mxu3 %v1600_v2  ;;  %v1590_v23 = vld [vmem:[%s2062_s29 + $0xd8] sm:$0xff]  ;;  %v1591_v27 = vld [vmem:[%s2062_s29 + $0xe0] sm:$0xff]  ;;  %v1592_v31 = vld [vmem:[%s2062_s29 + $0xe8] sm:$0xff] }
  0x1f   : > { %v1569_v32 = vld [vmem:[%s2062_s29 + $0x30] sm:$0xff]  ;;  %v1570_v36 = vld [vmem:[%s2062_s29 + $0x38] sm:$0xff]  ;;  %v2100_v42 = vld [vmem:[%s2243_s2] ss:$0 sm:$0xff]  ;;  %p1901_p5 = pnand %p1900_p3, %p1896_p0 }
  0x20   : > { %v1577_v33 = vld [vmem:[%s2062_s29 + $0x70] sm:$0xff]  ;;  %v1578_v37 = vld [vmem:[%s2062_s29 + $0x78] sm:$0xff] }
  0x21   : > { %706 = vmatpush.bf16.msra.mxu0 %v1599_v3  ;;  %1804 = vmatpush.bf16.msra.mxu1 %v1599_v3  ;;  %v1585_v34 = vld [vmem:[%s2062_s29 + $0xb0] sm:$0xff]  ;;  %v1586_v38 = vld [vmem:[%s2062_s29 + $0xb8] sm:$0xff] }
  0x22   : > { %1805 = vmatpush.bf16.msra.mxu2 %v1599_v3  ;;  %1806 = vmatpush.bf16.msra.mxu3 %v1599_v3  ;;  %v1593_v35 = vld [vmem:[%s2062_s29 + $0xf0] sm:$0xff]  ;;  %v1594_v39 = vld [vmem:[%s2062_s29 + $0xf8] sm:$0xff] }
  0x25   : > { %707 = vmatpush.bf16.msra.mxu0 %v1598_v4  ;;  %1807 = vmatpush.bf16.msra.mxu1 %v1598_v4 }
  0x26   : > { %1808 = vmatpush.bf16.msra.mxu2 %v1598_v4  ;;  %1809 = vmatpush.bf16.msra.mxu3 %v1598_v4 }
  0x29   : > { %708 = vmatpush.bf16.msra.mxu0 %v1597_v5  ;;  %1810 = vmatpush.bf16.msra.mxu1 %v1597_v5 }
  0x2a   : > { %1811 = vmatpush.bf16.msra.mxu2 %v1597_v5  ;;  %1812 = vmatpush.bf16.msra.mxu3 %v1597_v5 }
  0x2d   : > { %709 = vmatpush.bf16.msra.mxu0 %v1596_v6  ;;  %1813 = vmatpush.bf16.msra.mxu1 %v1596_v6 }
  0x2e   : > { %1814 = vmatpush.bf16.msra.mxu2 %v1596_v6  ;;  %1815 = vmatpush.bf16.msra.mxu3 %v1596_v6 }
  0x31   : > { %710 = vmatpush.bf16.msra.mxu0 %v1595_v7  ;;  %1816 = vmatpush.bf16.msra.mxu1 %v1595_v7 }
  0x32   : > { %1817 = vmatpush.bf16.msra.mxu2 %v1595_v7  ;;  %1818 = vmatpush.bf16.msra.mxu3 %v1595_v7 }
  0x34   : > { %711 = vmatmul.bf16.vlgmr.msra.gmra.mxu0 %v1563_v8  ;;  %751 = vmatmul.bf16.vlgmr.msra.gmra.mxu1 %v1571_v9 }
  0x35   : > { %791 = vmatmul.bf16.vlgmr.msra.gmra.mxu2 %v1579_v10  ;;  %831 = vmatmul.bf16.vlgmr.msra.gmra.mxu3 %v1587_v11 }
  0x44   : > { %716 = vmatmul.bf16.gmra.mxu0 %v1564_v12  ;;  %756 = vmatmul.bf16.gmra.mxu1 %v1572_v13 }
  0x45   : > { %796 = vmatmul.bf16.gmra.mxu2 %v1580_v14  ;;  %836 = vmatmul.bf16.gmra.mxu3 %v1588_v15 }
  0x54   : > { %721 = vmatmul.bf16.gmra.mxu0 %v1565_v16  ;;  %761 = vmatmul.bf16.gmra.mxu1 %v1573_v17 }
  0x55   : > { %801 = vmatmul.bf16.gmra.mxu2 %v1581_v18  ;;  %841 = vmatmul.bf16.gmra.mxu3 %v1589_v19 }
  0x64   : > { %726 = vmatmul.bf16.gmra.mxu0 %v1566_v20  ;;  %766 = vmatmul.bf16.gmra.mxu1 %v1574_v21 }
  0x65   : > { %806 = vmatmul.bf16.gmra.mxu2 %v1582_v22  ;;  %846 = vmatmul.bf16.gmra.mxu3 %v1590_v23 }
  0x74   : > { %731 = vmatmul.bf16.gmra.mxu0 %v1567_v24  ;;  %771 = vmatmul.bf16.gmra.mxu1 %v1575_v25 }
  0x75   : > { %811 = vmatmul.bf16.gmra.mxu2 %v1583_v26  ;;  %851 = vmatmul.bf16.gmra.mxu3 %v1591_v27 }
  0x84   : > { %736 = vmatmul.bf16.gmra.mxu0 %v1568_v28  ;;  %776 = vmatmul.bf16.gmra.mxu1 %v1576_v29 }
  0x85   : > { %816 = vmatmul.bf16.gmra.mxu2 %v1584_v30  ;;  %856 = vmatmul.bf16.gmra.mxu3 %v1592_v31 }
  0x94   : > { %741 = vmatmul.bf16.gmra.mxu0 %v1569_v32  ;;  %781 = vmatmul.bf16.gmra.mxu1 %v1577_v33 }
  0x95   : > { %821 = vmatmul.bf16.gmra.mxu2 %v1585_v34  ;;  %861 = vmatmul.bf16.gmra.mxu3 %v1593_v35 }
  0xa4   : > { %746 = vmatmul.bf16.gmra.mxu0 %v1570_v36  ;;  %786 = vmatmul.bf16.gmra.mxu1 %v1578_v37 }
  0xa5   : > { %826 = vmatmul.bf16.gmra.mxu2 %v1586_v38  ;;  %866 = vmatmul.bf16.gmra.mxu3 %v1594_v39 }
  0xb1   : > { %v712_v40 = vpop.f32.mrf.mxu0  ;;  %v752_v41 = vpop.f32.mrf.mxu1 }
  0xb2   : > { %v1071_v47 = vadd.f32 %v2100_v42, %v712_v40  ;;  %v1087_v48 = vadd.f32 %v2100_v42, %v752_v41 }
  0xb8   : > { %v792_v43 = vpop.f32.mrf.mxu2  ;;  %v832_v44 = vpop.f32.mrf.mxu3 }
  0xb9   : > { %v714_v45 = vpop.f32.mrf.mxu0  ;;  %v754_v46 = vpop.f32.mrf.mxu1  ;;  %v1103_v55 = vadd.f32 %v2100_v42, %v792_v43  ;;  %v1119_v56 = vadd.f32 %v2100_v42, %v832_v44 }
  0xba   : > { %v1072_v49 = vadd.f32 %v2100_v42, %v714_v45  ;;  %v1088_v50 = vadd.f32 %v2100_v42, %v754_v46 }
  0xbc   : > { %v1607_v51 = vpack.c.bf16 %v1072_v49, %v1071_v47  ;;  %v1647_v52 = vpack.c.bf16 %v1088_v50, %v1087_v48 }
  0xbe   : > { %1608 = vst [vmem:[%s2108_s7] sm:$0xff] %v1607_v51  }
  0xbf   : > { %1771 = vst [vmem:[%s2108_s7 + $0x40] sm:$0xff] %v1647_v52  }
  0xc0   : > { %v794_v53 = vpop.f32.mrf.mxu2  ;;  %v834_v54 = vpop.f32.mrf.mxu3 }
  0xc1   : > { %v1104_v57 = vadd.f32 %v2100_v42, %v794_v53  ;;  %v1120_v58 = vadd.f32 %v2100_v42, %v834_v54  ;;  %v717_v59 = vpop.f32.mrf.mxu0  ;;  %v757_v60 = vpop.f32.mrf.mxu1 }
  0xc2   : > { %v1073_v3 = vadd.f32 %v2100_v42, %v717_v59  ;;  %v1089_v4 = vadd.f32 %v2100_v42, %v757_v60 }
  0xc3   : > { %v1687_v61 = vpack.c.bf16 %v1104_v57, %v1103_v55  ;;  %v1727_v62 = vpack.c.bf16 %v1120_v58, %v1119_v56 }
  0xc5   : > { %1779 = vst [vmem:[%s2108_s7 + $0x80] sm:$0xff] %v1687_v61  }
  0xc6   : > { %1787 = vst [vmem:[%s2108_s7 + $0xc0] sm:$0xff] %v1727_v62  }
  0xc8   : > { %v797_v63 = vpop.f32.mrf.mxu2  ;;  %v837_v0 = vpop.f32.mrf.mxu3 }
  0xc9   : > { %v719_v1 = vpop.f32.mrf.mxu0  ;;  %v759_v2 = vpop.f32.mrf.mxu1  ;;  %v1105_v11 = vadd.f32 %v2100_v42, %v797_v63  ;;  %v1121_v12 = vadd.f32 %v2100_v42, %v837_v0 }
  0xca   : > { %v1074_v5 = vadd.f32 %v2100_v42, %v719_v1  ;;  %v1090_v6 = vadd.f32 %v2100_v42, %v759_v2 }
  0xcc   : > { %v1612_v7 = vpack.c.bf16 %v1074_v5, %v1073_v3  ;;  %v1652_v8 = vpack.c.bf16 %v1090_v6, %v1089_v4 }
  0xce   : > { %1764 = vst [vmem:[%s2108_s7 + $0x8] sm:$0xff] %v1612_v7  }
  0xcf   : > { %1772 = vst [vmem:[%s2108_s7 + $0x48] sm:$0xff] %v1652_v8  }
  0xd0   : > { %v799_v9 = vpop.f32.mrf.mxu2  ;;  %v839_v10 = vpop.f32.mrf.mxu3 }
  0xd1   : > { %v1106_v13 = vadd.f32 %v2100_v42, %v799_v9  ;;  %v1122_v14 = vadd.f32 %v2100_v42, %v839_v10  ;;  %v722_v15 = vpop.f32.mrf.mxu0  ;;  %v762_v16 = vpop.f32.mrf.mxu1 }
  0xd2   : > { %v1075_v23 = vadd.f32 %v2100_v42, %v722_v15  ;;  %v1091_v24 = vadd.f32 %v2100_v42, %v762_v16 }
  0xd3   : > { %v1692_v17 = vpack.c.bf16 %v1106_v13, %v1105_v11  ;;  %v1732_v18 = vpack.c.bf16 %v1122_v14, %v1121_v12 }
  0xd5   : > { %1780 = vst [vmem:[%s2108_s7 + $0x88] sm:$0xff] %v1692_v17  }
  0xd6   : > { %1788 = vst [vmem:[%s2108_s7 + $0xc8] sm:$0xff] %v1732_v18  }
  0xd8   : > { %v802_v19 = vpop.f32.mrf.mxu2  ;;  %v842_v20 = vpop.f32.mrf.mxu3 }
  0xd9   : > { %v724_v21 = vpop.f32.mrf.mxu0  ;;  %v764_v22 = vpop.f32.mrf.mxu1  ;;  %v1107_v31 = vadd.f32 %v2100_v42, %v802_v19  ;;  %v1123_v32 = vadd.f32 %v2100_v42, %v842_v20 }
  0xda   : > { %v1076_v25 = vadd.f32 %v2100_v42, %v724_v21  ;;  %v1092_v26 = vadd.f32 %v2100_v42, %v764_v22 }
  0xdc   : > { %v1617_v27 = vpack.c.bf16 %v1076_v25, %v1075_v23  ;;  %v1657_v28 = vpack.c.bf16 %v1092_v26, %v1091_v24 }
  0xde   : > { %1765 = vst [vmem:[%s2108_s7 + $0x10] sm:$0xff] %v1617_v27  }
  0xdf   : > { %1773 = vst [vmem:[%s2108_s7 + $0x50] sm:$0xff] %v1657_v28  }
  0xe0   : > { %v804_v29 = vpop.f32.mrf.mxu2  ;;  %v844_v30 = vpop.f32.mrf.mxu3 }
  0xe1   : > { %v1108_v33 = vadd.f32 %v2100_v42, %v804_v29  ;;  %v1124_v34 = vadd.f32 %v2100_v42, %v844_v30  ;;  %v727_v35 = vpop.f32.mrf.mxu0  ;;  %v767_v36 = vpop.f32.mrf.mxu1 }
  0xe2   : > { %v1077_v44 = vadd.f32 %v2100_v42, %v727_v35  ;;  %v1093_v45 = vadd.f32 %v2100_v42, %v767_v36 }
  0xe3   : > { %v1697_v37 = vpack.c.bf16 %v1108_v33, %v1107_v31  ;;  %v1737_v38 = vpack.c.bf16 %v1124_v34, %v1123_v32 }
  0xe5   : > { %1781 = vst [vmem:[%s2108_s7 + $0x90] sm:$0xff] %v1697_v37  }
  0xe6   : > { %1789 = vst [vmem:[%s2108_s7 + $0xd0] sm:$0xff] %v1737_v38  }
  0xe8   : > { %v807_v39 = vpop.f32.mrf.mxu2  ;;  %v847_v40 = vpop.f32.mrf.mxu3 }
  0xe9   : > { %v729_v41 = vpop.f32.mrf.mxu0  ;;  %v769_v43 = vpop.f32.mrf.mxu1  ;;  %v1109_v52 = vadd.f32 %v2100_v42, %v807_v39  ;;  %v1125_v53 = vadd.f32 %v2100_v42, %v847_v40 }
  0xea   : > { %v1078_v46 = vadd.f32 %v2100_v42, %v729_v41  ;;  %v1094_v47 = vadd.f32 %v2100_v42, %v769_v43 }
  0xec   : > { %v1622_v48 = vpack.c.bf16 %v1078_v46, %v1077_v44  ;;  %v1662_v49 = vpack.c.bf16 %v1094_v47, %v1093_v45 }
  0xee   : > { %1766 = vst [vmem:[%s2108_s7 + $0x18] sm:$0xff] %v1622_v48  }
  0xef   : > { %1774 = vst [vmem:[%s2108_s7 + $0x58] sm:$0xff] %v1662_v49  }
  0xf0   : > { %v809_v50 = vpop.f32.mrf.mxu2  ;;  %v849_v51 = vpop.f32.mrf.mxu3 }
  0xf1   : > { %v1110_v54 = vadd.f32 %v2100_v42, %v809_v50  ;;  %v1126_v55 = vadd.f32 %v2100_v42, %v849_v51  ;;  %v732_v56 = vpop.f32.mrf.mxu0  ;;  %v772_v57 = vpop.f32.mrf.mxu1 }
  0xf2   : > { %v1079_v0 = vadd.f32 %v2100_v42, %v732_v56  ;;  %v1095_v1 = vadd.f32 %v2100_v42, %v772_v57 }
  0xf3   : > { %v1702_v58 = vpack.c.bf16 %v1110_v54, %v1109_v52  ;;  %v1742_v59 = vpack.c.bf16 %v1126_v55, %v1125_v53 }
  0xf5   : > { %1782 = vst [vmem:[%s2108_s7 + $0x98] sm:$0xff] %v1702_v58  }
  0xf6   : > { %1790 = vst [vmem:[%s2108_s7 + $0xd8] sm:$0xff] %v1742_v59  }
  0xf8   : > { %v812_v60 = vpop.f32.mrf.mxu2  ;;  %v852_v61 = vpop.f32.mrf.mxu3 }
  0xf9   : > { %v734_v62 = vpop.f32.mrf.mxu0  ;;  %v774_v63 = vpop.f32.mrf.mxu1  ;;  %v1111_v8 = vadd.f32 %v2100_v42, %v812_v60  ;;  %v1127_v9 = vadd.f32 %v2100_v42, %v852_v61 }
  0xfa   : > { %v1080_v2 = vadd.f32 %v2100_v42, %v734_v62  ;;  %v1096_v3 = vadd.f32 %v2100_v42, %v774_v63 }
  0xfc   : > { %v1627_v4 = vpack.c.bf16 %v1080_v2, %v1079_v0  ;;  %v1667_v5 = vpack.c.bf16 %v1096_v3, %v1095_v1 }
  0xfe   : > { %1767 = vst [vmem:[%s2108_s7 + $0x20] sm:$0xff] %v1627_v4  }
  0xff   : > { %1775 = vst [vmem:[%s2108_s7 + $0x60] sm:$0xff] %v1667_v5  }
 0x100   : > { %v814_v6 = vpop.f32.mrf.mxu2  ;;  %v854_v7 = vpop.f32.mrf.mxu3 }
 0x101   : > { %v1112_v10 = vadd.f32 %v2100_v42, %v814_v6  ;;  %v1128_v11 = vadd.f32 %v2100_v42, %v854_v7  ;;  %v737_v12 = vpop.f32.mrf.mxu0  ;;  %v777_v13 = vpop.f32.mrf.mxu1 }
 0x102   : > { %v1081_v20 = vadd.f32 %v2100_v42, %v737_v12  ;;  %v1097_v21 = vadd.f32 %v2100_v42, %v777_v13 }
 0x103   : > { %v1707_v14 = vpack.c.bf16 %v1112_v10, %v1111_v8  ;;  %v1747_v15 = vpack.c.bf16 %v1128_v11, %v1127_v9 }
 0x105   : > { %1783 = vst [vmem:[%s2108_s7 + $0xa0] sm:$0xff] %v1707_v14  }
 0x106   : > { %1791 = vst [vmem:[%s2108_s7 + $0xe0] sm:$0xff] %v1747_v15  }
 0x108   : > { %v817_v16 = vpop.f32.mrf.mxu2  ;;  %v857_v17 = vpop.f32.mrf.mxu3 }
 0x109   : > { %v739_v18 = vpop.f32.mrf.mxu0  ;;  %v779_v19 = vpop.f32.mrf.mxu1  ;;  %v1113_v28 = vadd.f32 %v2100_v42, %v817_v16  ;;  %v1129_v29 = vadd.f32 %v2100_v42, %v857_v17 }
 0x10a   : > { %v1082_v22 = vadd.f32 %v2100_v42, %v739_v18  ;;  %v1098_v23 = vadd.f32 %v2100_v42, %v779_v19 }
 0x10c   : > { %v1632_v24 = vpack.c.bf16 %v1082_v22, %v1081_v20  ;;  %v1672_v25 = vpack.c.bf16 %v1098_v23, %v1097_v21 }
 0x10e   : > { %1768 = vst [vmem:[%s2108_s7 + $0x28] sm:$0xff] %v1632_v24  }
 0x10f   : > { %1776 = vst [vmem:[%s2108_s7 + $0x68] sm:$0xff] %v1672_v25  }
 0x110   : > { %v819_v26 = vpop.f32.mrf.mxu2  ;;  %v859_v27 = vpop.f32.mrf.mxu3 }
 0x111   : > { %v1114_v30 = vadd.f32 %v2100_v42, %v819_v26  ;;  %v1130_v31 = vadd.f32 %v2100_v42, %v859_v27  ;;  %v742_v32 = vpop.f32.mrf.mxu0  ;;  %v782_v33 = vpop.f32.mrf.mxu1 }
 0x112   : > { %v1083_v40 = vadd.f32 %v2100_v42, %v742_v32  ;;  %v1099_v41 = vadd.f32 %v2100_v42, %v782_v33 }
 0x113   : > { %v1712_v34 = vpack.c.bf16 %v1114_v30, %v1113_v28  ;;  %v1752_v35 = vpack.c.bf16 %v1130_v31, %v1129_v29 }
 0x115   : > { %1784 = vst [vmem:[%s2108_s7 + $0xa8] sm:$0xff] %v1712_v34  }
 0x116   : > { %1792 = vst [vmem:[%s2108_s7 + $0xe8] sm:$0xff] %v1752_v35  }
 0x118   : > { %v822_v36 = vpop.f32.mrf.mxu2  ;;  %v862_v37 = vpop.f32.mrf.mxu3 }
 0x119   : > { %v744_v38 = vpop.f32.mrf.mxu0  ;;  %v784_v39 = vpop.f32.mrf.mxu1  ;;  %v1115_v49 = vadd.f32 %v2100_v42, %v822_v36  ;;  %v1131_v50 = vadd.f32 %v2100_v42, %v862_v37 }
 0x11a   : > { %v1084_v43 = vadd.f32 %v2100_v42, %v744_v38  ;;  %v1100_v44 = vadd.f32 %v2100_v42, %v784_v39 }
 0x11c   : > { %v1637_v45 = vpack.c.bf16 %v1084_v43, %v1083_v40  ;;  %v1677_v46 = vpack.c.bf16 %v1100_v44, %v1099_v41 }
 0x11e   : > { %1769 = vst [vmem:[%s2108_s7 + $0x30] sm:$0xff] %v1637_v45  }
 0x11f   : > { %1777 = vst [vmem:[%s2108_s7 + $0x70] sm:$0xff] %v1677_v46  }
 0x120   : > { %v824_v47 = vpop.f32.mrf.mxu2  ;;  %v864_v48 = vpop.f32.mrf.mxu3 }
 0x121   : > { %v1116_v51 = vadd.f32 %v2100_v42, %v824_v47  ;;  %v1132_v52 = vadd.f32 %v2100_v42, %v864_v48  ;;  %v747_v53 = vpop.f32.mrf.mxu0  ;;  %v787_v54 = vpop.f32.mrf.mxu1 }
 0x122   : > { %v1085_v61 = vadd.f32 %v2100_v42, %v747_v53  ;;  %v1101_v62 = vadd.f32 %v2100_v42, %v787_v54 }
 0x123   : > { %v1717_v55 = vpack.c.bf16 %v1116_v51, %v1115_v49  ;;  %v1757_v56 = vpack.c.bf16 %v1132_v52, %v1131_v50 }
 0x125   : > { %1785 = vst [vmem:[%s2108_s7 + $0xb0] sm:$0xff] %v1717_v55  }
 0x126   : > { %1793 = vst [vmem:[%s2108_s7 + $0xf0] sm:$0xff] %v1757_v56  }
 0x128   : > { %v827_v57 = vpop.f32.mrf.mxu2  ;;  %v867_v58 = vpop.f32.mrf.mxu3 }
 0x129   : > { %v749_v59 = vpop.f32.mrf.mxu0  ;;  %v789_v60 = vpop.f32.mrf.mxu1  ;;  %v1117_v5 = vadd.f32 %v2100_v42, %v827_v57  ;;  %v1133_v6 = vadd.f32 %v2100_v42, %v867_v58 }
 0x12a   : > { %v1086_v63 = vadd.f32 %v2100_v42, %v749_v59  ;;  %v1102_v0 = vadd.f32 %v2100_v42, %v789_v60 }
 0x12c   : > { %v1642_v1 = vpack.c.bf16 %v1086_v63, %v1085_v61  ;;  %v1682_v2 = vpack.c.bf16 %v1102_v0, %v1101_v62 }
 0x12e   : > { %1770 = vst [vmem:[%s2108_s7 + $0x38] sm:$0xff] %v1642_v1  }
 0x12f   : > { %1778 = vst [vmem:[%s2108_s7 + $0x78] sm:$0xff] %v1682_v2  }
 0x130   : > { %v829_v3 = vpop.f32.mrf.mxu2  ;;  %v869_v4 = vpop.f32.mrf.mxu3 }
 0x131   : > { %v1118_v7 = vadd.f32 %v2100_v42, %v829_v3  ;;  %v1134_v8 = vadd.f32 %v2100_v42, %v869_v4 }
 0x133   : > { %v1722_v9 = vpack.c.bf16 %v1118_v7, %v1117_v5  ;;  %v1762_v10 = vpack.c.bf16 %v1134_v8, %v1133_v6 }
 0x135   : > { %1786 = vst [vmem:[%s2108_s7 + $0xb8] sm:$0xff] %v1722_v9  }
 0x136   : > { %1794 = vst [vmem:[%s2108_s7 + $0xf8] sm:$0xff] %v1762_v10  }
 0x137   : > { %1904 = shalt.err (!%p1901_p5)
}
 0x138   : > { %s1957_s30 = smov 64   ;;  %s1958_s5 = smov 4  }
 0x139   : > { %1819 = dma.vmem_to_hbm [thread:$0]  (%p2019_p4), %s1278_s18, 4096, %s1280_s19, %s1264_s15, %s1957_s30, %s1957_s30, %s1958_s5  }
 0x13a PF: > { %p1825_p6 = scmp.ge.s32.totalorder %s1955_s17, 2  ;;  %s1294_s6 = sand.u32 1, %s1935_s12  }
 0x13b   : > { %s1295_s7 = scalar_lea.sflag [#allocation4], %s1294_s6 }
 0x13c   : > { %p1822_p7 = pnand %p1825_p6, %p2026_p8 }
 0x13e   : > { %p1823_p9 = pneg %p1822_p7 }
 0x140   : > { %1930 = dma.done.wait (%p1823_p9), %s1295_s7, 4096  }
 0x141   : > { %1932 = vsyncadd (%p1823_p9), %s1295_s7, 4294963200  ;;  %s16_s17 = sadd.s32 1, %s1955_s17   ;;  %s2247_s12 = smov %s1939_s13 }
 0x142   : > { %p13_p10 = scmp.ge.s32.totalorder %s16_s17, 6   ;;  %s2248_s13 = smov %s1943_s14 }
 0x143   : > { %s2249_s14 = smov %s2032_s25  ;;  %s2250_s15 = smov %s1951_s16 }
 0x144   : > { %s2251_s16 = smov %s2253_s20  ;;  %15 = sbr.rel (!%p13_p10) target bundleno = 4 (0x4), region = 81 }
 0x149   :  { %1301 = vsyncpa [#allocation4], 1 }
 0x14a   :  { %1303 = vsyncpa [#allocation4 + $0x1], 1 }

</bundles_post_ra>
